<compile_context>
chip_gen: v6e
topology: v6e:2x2x1
jax: 0.10.0
libtpu: 0.0.40
codegen_flags: <defaults>
</compile_context>

<pallas_src>
import jax
import jax.numpy as jnp
from jax.experimental import pallas as pl
from jax.experimental.pallas import tpu as pltpu

# Real layer sizes and lane-padded hidden sizes.
D_IN = 190
H0, H1, H2 = 140, 100, 50           # fc0 / fc4 / fc5 fan_out
H0_P, H1_P, H2_P = 256, 128, 128    # padded to lane multiples
DIMS = [(190, 140), (140, 100), (100, 50), (50, 1)]


def _round_up(x, m):
    return (x + m - 1) // m * m


def _mlp_kernel(x_ref,
                w0_ref, b0_ref,
                w1_ref, b1_ref,
                w2_ref, b2_ref,
                w3_ref, b3_ref,
                o_ref):
    """Fully fused 4-layer MLP for one (tb, 190) batch tile.

    Layers 0-2: MXU matmuls (operands in w*_ref.dtype), f32 accumulation,
    f32 bias + ReLU.  Layer 3 (1 real output feature): f32 VPU multiply
    against fc6's weight column laid out as a (1, 128) lane row, plus a
    one-hot bias row, then a cross-lane (XLU) reduce -> (tb, 1) f32 store.
    """
    cd = w0_ref.dtype  # MXU operand dtype (bf16 or f32)

    h = jnp.dot(x_ref[...].astype(cd), w0_ref[...],
                preferred_element_type=jnp.float32) + b0_ref[...]
    h = jnp.maximum(h, 0.0)

    h = jnp.dot(h.astype(cd), w1_ref[...],
                preferred_element_type=jnp.float32) + b1_ref[...]
    h = jnp.maximum(h, 0.0)

    h = jnp.dot(h.astype(cd), w2_ref[...],
                preferred_element_type=jnp.float32) + b2_ref[...]
    h = jnp.maximum(h, 0.0)

    # Final layer: out[r] = sum_k h[r, k] * w3[k] + b3  (padded lanes are 0).
    y = jnp.sum(h * w3_ref[...] + b3_ref[...], axis=-1, keepdims=True)
    o_ref[...] = y.astype(o_ref.dtype)


def init_params(key):
    """nn.Linear-style U(-1/sqrt(fan_in), 1/sqrt(fan_in)) init, (in, out) weights."""
    params = {}
    for i, (fan_in, fan_out) in enumerate(DIMS):
        key, kw, kb = jax.random.split(key, 3)
        bound = 1.0 / jnp.sqrt(float(fan_in))
        params[f"w{i}"] = jax.random.uniform(
            kw, (fan_in, fan_out), jnp.float32, minval=-bound, maxval=bound)
        params[f"b{i}"] = jax.random.uniform(
            kb, (1, fan_out), jnp.float32, minval=-bound, maxval=bound)
    return params


def prepare_params(params, compute_dtype=jnp.bfloat16):
    """One-time host prep: zero-pad hidden dims to lane multiples, cast MXU
    weights to compute_dtype, keep biases f32.  Zero padding is exact
    (padded weight rows/cols and bias cols are 0; ReLU(0) == 0).

    Layer 0 keeps K = 190 so x can be fed unpadded.  Layer 3 is stored as a
    (1, 128) f32 lane row (transposed weight column) plus a (1, 128) one-hot
    bias row, consumed by the VPU reduce in the kernel.
    """
    p = {}
    p["w0"] = jnp.pad(params["w0"], ((0, 0), (0, H0_P - H0))).astype(compute_dtype)
    p["b0"] = jnp.pad(params["b0"], ((0, 0), (0, H0_P - H0))).astype(jnp.float32)

    p["w1"] = jnp.pad(params["w1"], ((0, H0_P - H0), (0, H1_P - H1))).astype(compute_dtype)
    p["b1"] = jnp.pad(params["b1"], ((0, 0), (0, H1_P - H1))).astype(jnp.float32)

    p["w2"] = jnp.pad(params["w2"], ((0, H1_P - H1), (0, H2_P - H2))).astype(compute_dtype)
    p["b2"] = jnp.pad(params["b2"], ((0, 0), (0, H2_P - H2))).astype(jnp.float32)

    w3_col = params["w3"][:, 0]                                  # (50,)
    p["w3"] = jnp.pad(w3_col, (0, H2_P - H2)).reshape(1, H2_P).astype(jnp.float32)
    b3 = params["b3"].astype(jnp.float32)[0, 0]
    p["b3"] = jnp.zeros((1, H2_P), jnp.float32).at[0, 0].set(b3)  # one-hot bias row
    return p


def mlp_forward(x, prepped_params, *, batch_tile=2048):
    """x: (B, 190) float.  prepped_params: output of prepare_params().
    Returns (B, 1) f32.

    batch_tile: rows per grid step (multiple of 8; 2048 fits comfortably in
    the 32 MiB VMEM limit on every generation, including v7x's 64 MiB core).
    For best v7x megacore utilization pick B / batch_tile >= 2.
    """
    B, d = x.shape
    assert d == D_IN, f"expected {D_IN} input features, got {d}"
    x = x.astype(jnp.float32)

    # Sublane-align the batch (tiny host pad only when B % 8 != 0).
    b_al = _round_up(B, 8)
    if b_al != B:
        x = jnp.pad(x, ((0, b_al - B), (0, 0)))

    tb = min(_round_up(batch_tile, 8), b_al)
    grid = pl.cdiv(b_al, tb)
    out_rows = grid * tb  # output sized to full grid coverage (writes in-bounds)

    def tile_map(i):      # batch-tiled operands (x, out): new block per step
        return (i, 0)

    def resident_map(i):  # weights/biases: same block every step -> stay in VMEM
        return (0, 0)

    operands = [x]
    in_specs = [pl.BlockSpec((tb, D_IN), tile_map)]
    for name in ("w0", "b0", "w1", "b1", "w2", "b2", "w3", "b3"):
        arr = prepped_params[name]
        operands.append(arr)
        in_specs.append(pl.BlockSpec(arr.shape, resident_map))

    out = pl.pallas_call(
        _mlp_kernel,
        out_shape=jax.ShapeDtypeStruct((out_rows, 1), jnp.float32),
        grid=(grid,),
        in_specs=in_specs,
        out_specs=pl.BlockSpec((tb, 1), tile_map),
        compiler_params=pltpu.CompilerParams(
            dimension_semantics=("parallel",),
            vmem_limit_bytes=32 * 1024 * 1024),
    )(*operands)

    return out[:B]


def reference_forward(x, params, compute_dtype=jnp.float32):
    """Pure-JAX reference using the same cast/accumulation scheme as the kernel
    (bf16/f32 MXU operands for layers 0-2, f32 final layer and accumulation)."""
    h = x.astype(jnp.float32)
    for i in range(3):
        w = params[f"w{i}"].astype(compute_dtype)
        b = params[f"b{i}"].astype(jnp.float32)
        h = jnp.dot(h.astype(compute_dtype), w,
                    preferred_element_type=jnp.float32) + b
        h = jnp.maximum(h, 0.0)
    return jnp.dot(h, params["w3"].astype(jnp.float32),
                   preferred_element_type=jnp.float32) + params["b3"].astype(jnp.float32)


if __name__ == "__main__":
    key = jax.random.PRNGKey(0)
    key, kx = jax.random.split(key)

    B = 8
    x = jax.random.normal(kx, (B, D_IN), dtype=jnp.float32)
    params = init_params(key)

    # f32-operand validation path (padding scheme is mathematically exact).
    out_f32 = jax.block_until_ready(
        mlp_forward(x, prepare_params(params, jnp.float32)))
    ref_f32 = reference_forward(x, params, jnp.float32)
    assert out_f32.shape == (B, 1), out_f32.shape
    assert jnp.allclose(out_f32, ref_f32, atol=1e-4, rtol=1e-4), \
        "f32 kernel mismatch vs pure-JAX reference"

    # bf16-operand / f32-accumulation path (recommended default), compared
    # against a reference with the identical cast scheme.
    out_bf16 = jax.block_until_ready(
        mlp_forward(x, prepare_params(params, jnp.bfloat16)))
    ref_bf16 = reference_forward(x, params, jnp.bfloat16)
    assert out_bf16.shape == (B, 1), out_bf16.shape
    assert jnp.allclose(out_bf16, ref_bf16, atol=3e-3, rtol=3e-3), \
        "bf16 kernel mismatch vs pure-JAX reference"

    print("KERNEL_OK")
</pallas_src>

<mosaic_0001>
module attributes {stable_mosaic.version = 11 : i64} {
  func.func @_mlp_kernel(%arg0: i32, %arg1: memref<8x190xf32, #tpu.memory_space<vmem>>, %arg2: memref<190x256xf32, #tpu.memory_space<vmem>>, %arg3: memref<1x256xf32, #tpu.memory_space<vmem>>, %arg4: memref<256x128xf32, #tpu.memory_space<vmem>>, %arg5: memref<1x128xf32, #tpu.memory_space<vmem>>, %arg6: memref<128x128xf32, #tpu.memory_space<vmem>>, %arg7: memref<1x128xf32, #tpu.memory_space<vmem>>, %arg8: memref<1x128xf32, #tpu.memory_space<vmem>>, %arg9: memref<1x128xf32, #tpu.memory_space<vmem>>, %arg10: memref<8x1xf32, #tpu.memory_space<vmem>>) attributes {dimension_semantics = [#tpu.dimension_semantics<parallel>], iteration_bounds = array<i64: 1>, scalar_prefetch = 0 : i64, scratch_operands = 0 : i64, tpu.core_type = #tpu.core_type<tc>, window_params = [{transform_indices = @transform_0, window_bounds = array<i64: 8, 190>}, {pipeline_mode = #tpu.pipeline_mode<synchronous>, transform_indices = @transform_1, window_bounds = array<i64: 190, 256>}, {pipeline_mode = #tpu.pipeline_mode<synchronous>, transform_indices = @transform_2, window_bounds = array<i64: 1, 256>}, {pipeline_mode = #tpu.pipeline_mode<synchronous>, transform_indices = @transform_3, window_bounds = array<i64: 256, 128>}, {pipeline_mode = #tpu.pipeline_mode<synchronous>, transform_indices = @transform_4, window_bounds = array<i64: 1, 128>}, {pipeline_mode = #tpu.pipeline_mode<synchronous>, transform_indices = @transform_5, window_bounds = array<i64: 128, 128>}, {pipeline_mode = #tpu.pipeline_mode<synchronous>, transform_indices = @transform_6, window_bounds = array<i64: 1, 128>}, {pipeline_mode = #tpu.pipeline_mode<synchronous>, transform_indices = @transform_7, window_bounds = array<i64: 1, 128>}, {pipeline_mode = #tpu.pipeline_mode<synchronous>, transform_indices = @transform_8, window_bounds = array<i64: 1, 128>}, {transform_indices = @transform_9, window_bounds = array<i64: 8, 1>}]} {
    %c0 = arith.constant 0 : index
    %c0_0 = arith.constant 0 : index
    %0 = vector.load %arg1[%c0, %c0_0] : memref<8x190xf32, #tpu.memory_space<vmem>>, vector<8x190xf32>
    %c0_1 = arith.constant 0 : index
    %c0_2 = arith.constant 0 : index
    %1 = vector.load %arg2[%c0_1, %c0_2] : memref<190x256xf32, #tpu.memory_space<vmem>>, vector<190x256xf32>
    %cst = arith.constant dense<0.000000e+00> : vector<8x256xf32>
    %2 = tpu.matmul %0, %1, %cst {dimension_numbers = #tpu.dot_dimension_numbers<[1], [0], [0], [1], [0, 0, 1, 1], [], []>} : vector<8x190xf32>, vector<190x256xf32>, vector<8x256xf32> -> vector<8x256xf32>
    %c0_3 = arith.constant 0 : index
    %c0_4 = arith.constant 0 : index
    %3 = vector.load %arg3[%c0_3, %c0_4] : memref<1x256xf32, #tpu.memory_space<vmem>>, vector<1x256xf32>
    %4 = vector.broadcast %3 : vector<1x256xf32> to vector<8x256xf32>
    %5 = arith.addf %2, %4 : vector<8x256xf32>
    %cst_5 = arith.constant 0.000000e+00 : f32
    %6 = vector.broadcast %cst_5 : f32 to vector<8x256xf32>
    %7 = arith.maximumf %5, %6 : vector<8x256xf32>
    %c0_6 = arith.constant 0 : index
    %c0_7 = arith.constant 0 : index
    %8 = vector.load %arg4[%c0_6, %c0_7] : memref<256x128xf32, #tpu.memory_space<vmem>>, vector<256x128xf32>
    %cst_8 = arith.constant dense<0.000000e+00> : vector<8x128xf32>
    %9 = tpu.matmul %7, %8, %cst_8 {dimension_numbers = #tpu.dot_dimension_numbers<[1], [0], [0], [1], [0, 0, 1, 1], [], []>} : vector<8x256xf32>, vector<256x128xf32>, vector<8x128xf32> -> vector<8x128xf32>
    %c0_9 = arith.constant 0 : index
    %c0_10 = arith.constant 0 : index
    %10 = vector.load %arg5[%c0_9, %c0_10] : memref<1x128xf32, #tpu.memory_space<vmem>>, vector<1x128xf32>
    %11 = vector.broadcast %10 : vector<1x128xf32> to vector<8x128xf32>
    %12 = arith.addf %9, %11 : vector<8x128xf32>
    %cst_11 = arith.constant 0.000000e+00 : f32
    %13 = vector.broadcast %cst_11 : f32 to vector<8x128xf32>
    %14 = arith.maximumf %12, %13 : vector<8x128xf32>
    %c0_12 = arith.constant 0 : index
    %c0_13 = arith.constant 0 : index
    %15 = vector.load %arg6[%c0_12, %c0_13] : memref<128x128xf32, #tpu.memory_space<vmem>>, vector<128x128xf32>
    %cst_14 = arith.constant dense<0.000000e+00> : vector<8x128xf32>
    %16 = tpu.matmul %14, %15, %cst_14 {dimension_numbers = #tpu.dot_dimension_numbers<[1], [0], [0], [1], [0, 0, 1, 1], [], []>} : vector<8x128xf32>, vector<128x128xf32>, vector<8x128xf32> -> vector<8x128xf32>
    %c0_15 = arith.constant 0 : index
    %c0_16 = arith.constant 0 : index
    %17 = vector.load %arg7[%c0_15, %c0_16] : memref<1x128xf32, #tpu.memory_space<vmem>>, vector<1x128xf32>
    %18 = vector.broadcast %17 : vector<1x128xf32> to vector<8x128xf32>
    %19 = arith.addf %16, %18 : vector<8x128xf32>
    %cst_17 = arith.constant 0.000000e+00 : f32
    %20 = vector.broadcast %cst_17 : f32 to vector<8x128xf32>
    %21 = arith.maximumf %19, %20 : vector<8x128xf32>
    %c0_18 = arith.constant 0 : index
    %c0_19 = arith.constant 0 : index
    %22 = vector.load %arg8[%c0_18, %c0_19] : memref<1x128xf32, #tpu.memory_space<vmem>>, vector<1x128xf32>
    %23 = vector.broadcast %22 : vector<1x128xf32> to vector<8x128xf32>
    %24 = arith.mulf %21, %23 : vector<8x128xf32>
    %c0_20 = arith.constant 0 : index
    %c0_21 = arith.constant 0 : index
    %25 = vector.load %arg9[%c0_20, %c0_21] : memref<1x128xf32, #tpu.memory_space<vmem>>, vector<1x128xf32>
    %26 = vector.broadcast %25 : vector<1x128xf32> to vector<8x128xf32>
    %27 = arith.addf %24, %26 : vector<8x128xf32>
    %cst_22 = arith.constant dense<0.000000e+00> : vector<8xf32>
    %28 = vector.multi_reduction <add>, %27, %cst_22 [1] : vector<8x128xf32> to vector<8xf32>
    %29 = vector.shape_cast %28 : vector<8xf32> to vector<8x1xf32>
    %c0_23 = arith.constant 0 : index
    %c0_24 = arith.constant 0 : index
    %30 = vector.load %arg10[%c0_23, %c0_24] : memref<8x1xf32, #tpu.memory_space<vmem>>, vector<8x1xf32>
    tpu.vector_store %arg10[%c0_23, %c0_24], %29 {strides = array<i32>} : memref<8x1xf32, #tpu.memory_space<vmem>>, vector<8x1xf32>,
    return
  }
  func.func @transform_0(%arg0: i32) -> (i32, i32) {
    %c0_i32 = arith.constant 0 : i32
    %c0_i32_0 = arith.constant 0 : i32
    return %arg0, %c0_i32 : i32, i32
  }
  func.func @transform_1(%arg0: i32) -> (i32, i32) {
    %c0_i32 = arith.constant 0 : i32
    %c0_i32_0 = arith.constant 0 : i32
    %c0_i32_1 = arith.constant 0 : i32
    return %c0_i32, %c0_i32_0 : i32, i32
  }
  func.func @transform_2(%arg0: i32) -> (i32, i32) {
    %c0_i32 = arith.constant 0 : i32
    %c0_i32_0 = arith.constant 0 : i32
    %c0_i32_1 = arith.constant 0 : i32
    return %c0_i32, %c0_i32_0 : i32, i32
  }
  func.func @transform_3(%arg0: i32) -> (i32, i32) {
    %c0_i32 = arith.constant 0 : i32
    %c0_i32_0 = arith.constant 0 : i32
    %c0_i32_1 = arith.constant 0 : i32
    return %c0_i32, %c0_i32_0 : i32, i32
  }
  func.func @transform_4(%arg0: i32) -> (i32, i32) {
    %c0_i32 = arith.constant 0 : i32
    %c0_i32_0 = arith.constant 0 : i32
    %c0_i32_1 = arith.constant 0 : i32
    return %c0_i32, %c0_i32_0 : i32, i32
  }
  func.func @transform_5(%arg0: i32) -> (i32, i32) {
    %c0_i32 = arith.constant 0 : i32
    %c0_i32_0 = arith.constant 0 : i32
    %c0_i32_1 = arith.constant 0 : i32
    return %c0_i32, %c0_i32_0 : i32, i32
  }
  func.func @transform_6(%arg0: i32) -> (i32, i32) {
    %c0_i32 = arith.constant 0 : i32
    %c0_i32_0 = arith.constant 0 : i32
    %c0_i32_1 = arith.constant 0 : i32
    return %c0_i32, %c0_i32_0 : i32, i32
  }
  func.func @transform_7(%arg0: i32) -> (i32, i32) {
    %c0_i32 = arith.constant 0 : i32
    %c0_i32_0 = arith.constant 0 : i32
    %c0_i32_1 = arith.constant 0 : i32
    return %c0_i32, %c0_i32_0 : i32, i32
  }
  func.func @transform_8(%arg0: i32) -> (i32, i32) {
    %c0_i32 = arith.constant 0 : i32
    %c0_i32_0 = arith.constant 0 : i32
    %c0_i32_1 = arith.constant 0 : i32
    return %c0_i32, %c0_i32_0 : i32, i32
  }
  func.func @transform_9(%arg0: i32) -> (i32, i32) {
    %c0_i32 = arith.constant 0 : i32
    %c0_i32_0 = arith.constant 0 : i32
    return %arg0, %c0_i32 : i32, i32
  }
}

</mosaic_0001>

<bundles_post_ra>
// kernel: tpu_custom_call.1
= control target key start
LH: loop header
LB: loop body
LE: loop exit
PB: predicated region body
PF: predicated region fallthrough
CT: control target
= control target key end

     0   :  { %14 = vsyncpa [#allocation3], 0  ;;  %s759_s0 = inlined_call_operand.hbm [shape: f32[8,190], index: 0, kind: input, shape index: {}]   ;;  %s760_s1 = inlined_call_operand.hbm [shape: f32[190,256], index: 1, kind: input, shape index: {}]   ;;  %s761_s2 = inlined_call_operand.vmem [shape: f32[1,256], index: 2, kind: input, shape index: {}]   ;;  %s762_s3 = inlined_call_operand.hbm [shape: f32[256,128], index: 3, kind: input, shape index: {}]   ;;  %s763_s4 = inlined_call_operand.vmem [shape: f32[1,128], index: 4, kind: input, shape index: {}]   ;;  %s764_s5 = inlined_call_operand.hbm [shape: f32[128,128], index: 5, kind: input, shape index: {}]   ;;  %s765_s6 = inlined_call_operand.vmem [shape: f32[1,128], index: 6, kind: input, shape index: {}]   ;;  %s766_s7 = inlined_call_operand.vmem [shape: f32[1,128], index: 7, kind: input, shape index: {}]   ;;  %s767_s8 = inlined_call_operand.vmem [shape: f32[1,128], index: 8, kind: input, shape index: {}]   ;;  %s768_s9 = inlined_call_operand.vmem [shape: f32[8,1], index: 9, kind: output, shape index: {}]  }
   0x1   :  { %15 = vsyncpa [#allocation5], 0 }
   0x2   :  { %16 = vsyncpa [#allocation8], 0  ;;  %s652_s30 = smov [#allocation4]  }
   0x3   :  { %s32_s10 = sshll.u32 %s652_s30, 4  ;;  %s33_s10 = int_to_ptr.vmem [resolvable:$true] %s32_s10 }
   0x4   :  { %s574_s11 = scalar_lea.vmem %s33_s10, 6144  ;;  %p579_p1 = scmp.lt.s32.totalorder %s33_s10, %s33_s10 }
   0x5   :  { %p575_p0 = scmp.ne.s32.totalorder %s33_s10, %s574_s11  ;;  %p580_p2 = scmp.lt.s32.totalorder %s574_s11, %s574_s11 }
   0x7   :  { %p581_p3 = por %p580_p2, %p579_p1 }
   0x9   :  { %p582_p4 = pnand %p581_p3, %p575_p0 }
   0xb   :  { %585 = shalt.err (!%p582_p4)
}
   0xc   :  { %s653_s12 = smov 256   ;;  %s654_s13 = smov 16  }
   0xd   :  { %38 = dma.hbm_to_vmem [thread:$0]  %s760_s1, 6144, %s33_s10, [#allocation5], %s653_s12, %s653_s12, %s654_s13  }
   0xe   :  { %s655_s16 = smov [#allocation2]   ;;  %s656_s18 = smov [#allocation6]  }
   0xf   :  { %s23_s17 = sshll.u32 %s655_s16, 4  ;;  %s46_s19 = sshll.u32 %s656_s18, 4  ;;  %s24_s17 = int_to_ptr.vmem [resolvable:$true] %s23_s17  ;;  %s47_s19 = int_to_ptr.vmem [resolvable:$true] %s46_s19 }
  0x10   :  { %s594_s20 = scalar_lea.vmem %s24_s17, 256  ;;  %p599_p6 = scmp.lt.s32.totalorder %s24_s17, %s24_s17 }
  0x11   :  { %p595_p5 = scmp.ne.s32.totalorder %s24_s17, %s594_s20  ;;  %p600_p7 = scmp.lt.s32.totalorder %s594_s20, %s594_s20 }
  0x13   :  { %p601_p8 = por %p600_p7, %p599_p6 }
  0x15   :  { %p602_p9 = pnand %p601_p8, %p595_p5 }
  0x17   :  { %605 = shalt.err (!%p602_p9)
}
  0x18   :  { %26 = dma.hbm_to_vmem [thread:$0]  %s759_s0, 256, %s24_s17, [#allocation3]  }
  0x19   :  { %s614_s23 = scalar_lea.vmem %s47_s19, 4096  ;;  %p619_p11 = scmp.lt.s32.totalorder %s47_s19, %s47_s19 }
  0x1a   :  { %p615_p10 = scmp.ne.s32.totalorder %s47_s19, %s614_s23  ;;  %p620_p12 = scmp.lt.s32.totalorder %s614_s23, %s614_s23 }
  0x1c   :  { %p621_p13 = por %p620_p12, %p619_p11 }
  0x1e   :  { %p622_p0 = pnand %p621_p13, %p615_p10 }
  0x20   :  { %625 = shalt.err (!%p622_p0)
}
  0x21   :  { %s657_s1 = smov 128   ;;  %s658_s24 = smov 8  }
  0x22   :  { %52 = dma.hbm_to_vmem [thread:$0]  %s762_s3, 4096, %s47_s19, [#allocation5], %s657_s1, %s657_s1, %s658_s24  }
  0x23   :  { %s659_s27 = smov [#allocation7]  }
  0x24   :  { %s60_s28 = sshll.u32 %s659_s27, 4  ;;  %s61_s28 = int_to_ptr.vmem [resolvable:$true] %s60_s28 }
  0x25   :  { %s634_s29 = scalar_lea.vmem %s61_s28, 2048  ;;  %p639_p2 = scmp.lt.s32.totalorder %s61_s28, %s61_s28 }
  0x26   :  { %p635_p1 = scmp.ne.s32.totalorder %s61_s28, %s634_s29  ;;  %p640_p3 = scmp.lt.s32.totalorder %s634_s29, %s634_s29 }
  0x28   :  { %p641_p4 = por %p640_p3, %p639_p2 }
  0x2a   :  { %p642_p5 = pnand %p641_p4, %p635_p1 }
  0x2c   :  { %645 = shalt.err (!%p642_p5)
}
  0x2d   :  { %66 = dma.hbm_to_vmem [thread:$0]  %s764_s5, 2048, %s61_s28, [#allocation8], %s657_s1, %s657_s1, %s658_s24  }
  0x2e   :  { %646 = dma.done.wait [#allocation3], 256  }
  0x2f   :  { %647 = vsyncadd [#allocation3], 4294967040 }
  0x30   :  { %648 = dma.done.wait [#allocation5], 10240  }
  0x31   :  { %649 = vsyncadd [#allocation5], 4294957056 }
  0x32   :  { %650 = dma.done.wait [#allocation8], 2048  }
  0x33   :  { %651 = vsyncadd [#allocation8], 4294965248  ;;  %v118_v0 = vld [vmem:[#allocation4 + $0xf8] sm:$0xff]  ;;  %v117_v1 = vld [vmem:[#allocation4 + $0xf0] sm:$0xff]  ;;  %vm147_vm0 = vcmask 506880   ;;  %vm151_vm1 = vcmask 1045504  }
  0x34   :  { %v116_v2 = vld [vmem:[#allocation4 + $0xe8] sm:$0xff]  ;;  %158 = vmatprep.subr.mxu0 %v118_v0  ;;  %v115_v3 = vld [vmem:[#allocation4 + $0xe0] sm:$0xff]  ;;  %v114_v4 = vld [vmem:[#allocation4 + $0xd8] sm:$0xff]  ;;  %vm661_vm2 = vmmov 0   ;;  %vm453_vm3 = vcmask 7168  }
  0x35   :  { %159 = vmatpush1.msra.mxu0 %v117_v1  ;;  %v113_v5 = vld [vmem:[#allocation4 + $0xd0] sm:$0xff]  ;;  %v112_v6 = vld [vmem:[#allocation4 + $0xc8] sm:$0xff]  ;;  %v111_v7 = vld [vmem:[#allocation4 + $0xc0] sm:$0xff] }
  0x36   :  { %160 = vmatprep.subr.mxu0 %v116_v2  ;;  %v110_v8 = vld [vmem:[#allocation4 + $0xb8] sm:$0xff]  ;;  %v109_v9 = vld [vmem:[#allocation4 + $0xb0] sm:$0xff]  ;;  %v108_v10 = vld [vmem:[#allocation4 + $0xa8] sm:$0xff] }
  0x37   :  { %161 = vmatpush1.msra.mxu0 %v115_v3  ;;  %v107_v11 = vld [vmem:[#allocation4 + $0xa0] sm:$0xff]  ;;  %v106_v12 = vld [vmem:[#allocation4 + $0x98] sm:$0xff]  ;;  %v105_v13 = vld [vmem:[#allocation4 + $0x90] sm:$0xff] }
  0x38   :  { %162 = vmatprep.subr.mxu0 %v114_v4  ;;  %v104_v14 = vld [vmem:[#allocation4 + $0x88] sm:$0xff]  ;;  %v103_v15 = vld [vmem:[#allocation4 + $0x80] sm:$0xff]  ;;  %v102_v16 = vld [vmem:[#allocation4 + $0x78] sm:$0xff] }
  0x39   :  { %163 = vmatpush1.msra.mxu0 %v113_v5  ;;  %v101_v17 = vld [vmem:[#allocation4 + $0x70] sm:$0xff]  ;;  %v100_v18 = vld [vmem:[#allocation4 + $0x68] sm:$0xff]  ;;  %v86_v19 = vld [vmem:[#allocation2 + $0x8] sm:$0xff] }
  0x3a   :  { %164 = vmatprep.subr.mxu0 %v112_v6  ;;  %v262_v20 = vld [vmem:[#allocation6 + $0xf8] sm:$0xff]  ;;  %v99_v21 = vld [vmem:[#allocation4 + $0x60] sm:$0xff]  ;;  %464 = vmatprep.mubr.msk.f32.mxu0 %vm147_vm0, %v86_v19  ;;  %v261_v23 = vld [vmem:[#allocation6 + $0xf0] sm:$0xff]  ;;  %v137_v19 = vlaneseq }
  0x3b   :  { %165 = vmatpush1.msra.mxu0 %v111_v7  ;;  %v246_v22 = vld [vmem:[#allocation6 + $0x78] sm:$0xff]  ;;  %469 = vmatprep.subr.mxu1 %v262_v20  ;;  %v245_v25 = vld [vmem:[#allocation6 + $0x70] sm:$0xff]  ;;  %v260_v27 = vld [vmem:[#allocation6 + $0xe8] sm:$0xff] }
  0x3c   :  { %166 = vmatprep.subr.mxu0 %v110_v8  ;;  %v98_v24 = vld [vmem:[#allocation4 + $0x58] sm:$0xff]  ;;  %v97_v26 = vld [vmem:[#allocation4 + $0x50] sm:$0xff]  ;;  %470 = vmatpush3.msra.mxu1 %v246_v22  ;;  %v96_v28 = vld [vmem:[#allocation4 + $0x48] sm:$0xff]  ;;  %v138_v20 = vshrl.u32 %v137_v19, 7 }
  0x3d   :  { %167 = vmatpush1.msra.mxu0 %v109_v9  ;;  %471 = vmatprep.subr.mxu1 %v261_v23  ;;  %v244_v29 = vld [vmem:[#allocation6 + $0x68] sm:$0xff]  ;;  %v95_v30 = vld [vmem:[#allocation4 + $0x40] sm:$0xff]  ;;  %v94_v32 = vld [vmem:[#allocation4 + $0x38] sm:$0xff] }
  0x3e   :  { %168 = vmatprep.subr.mxu0 %v108_v10  ;;  %472 = vmatpush3.msra.mxu1 %v245_v25  ;;  %v259_v31 = vld [vmem:[#allocation6 + $0xe0] sm:$0xff]  ;;  %v93_v34 = vld [vmem:[#allocation4 + $0x30] sm:$0xff]  ;;  %v258_v35 = vld [vmem:[#allocation6 + $0xd8] sm:$0xff]  ;;  %v143_v23 = vsub.s32 1, %v138_v20 }
  0x3f   :  { %169 = vmatpush1.msra.mxu0 %v107_v11  ;;  %473 = vmatprep.subr.mxu1 %v260_v27  ;;  %v243_v33 = vld [vmem:[#allocation6 + $0x60] sm:$0xff]  ;;  %v92_v36 = vld [vmem:[#allocation4 + $0x28] sm:$0xff]  ;;  %v242_v37 = vld [vmem:[#allocation6 + $0x58] sm:$0xff] }
  0x40   :  { %170 = vmatprep.subr.mxu0 %v106_v12  ;;  %474 = vmatpush3.msra.mxu1 %v244_v29  ;;  %v91_v38 = vld [vmem:[#allocation4 + $0x20] sm:$0xff]  ;;  %v257_v39 = vld [vmem:[#allocation6 + $0xd0] sm:$0xff]  ;;  %v90_v40 = vld [vmem:[#allocation4 + $0x18] sm:$0xff] }
  0x41   :  { %171 = vmatpush1.msra.mxu0 %v105_v13  ;;  %475 = vmatprep.subr.mxu1 %v259_v31  ;;  %v241_v41 = vld [vmem:[#allocation6 + $0x50] sm:$0xff]  ;;  %v256_v43 = vld [vmem:[#allocation6 + $0xc8] sm:$0xff]  ;;  %v87_v46 = vld [vmem:[#allocation4] sm:$0xff] }
  0x42   :  { %172 = vmatprep.subr.mxu0 %v104_v14  ;;  %476 = vmatpush3.msra.mxu1 %v243_v33  ;;  %v89_v42 = vld [vmem:[#allocation4 + $0x10] sm:$0xff]  ;;  %v88_v44 = vld [vmem:[#allocation4 + $0x8] sm:$0xff]  ;;  %v255_v47 = vld [vmem:[#allocation6 + $0xc0] sm:$0xff] }
  0x43   :  { %173 = vmatpush1.msra.mxu0 %v103_v15  ;;  %477 = vmatprep.subr.mxu1 %v258_v35  ;;  %v240_v45 = vld [vmem:[#allocation6 + $0x48] sm:$0xff]  ;;  %v134_v48 = vld [vmem:[#allocation4 + $0x178] sm:$0x3f]  ;;  %v239_v49 = vld [vmem:[#allocation6 + $0x40] sm:$0xff] }
  0x44   :  { %174 = vmatprep.subr.mxu0 %v102_v16  ;;  %478 = vmatpush3.msra.mxu1 %v242_v37  ;;  %v133_v50 = vld [vmem:[#allocation4 + $0x170] sm:$0x3f]  ;;  %v254_v51 = vld [vmem:[#allocation6 + $0xb8] sm:$0xff]  ;;  %v132_v52 = vld [vmem:[#allocation4 + $0x168] sm:$0xff] }
  0x45   :  { %175 = vmatpush1.msra.mxu0 %v101_v17  ;;  %479 = vmatprep.subr.mxu1 %v257_v39  ;;  %v238_v53 = vld [vmem:[#allocation6 + $0x38] sm:$0xff]  ;;  %v131_v54 = vld [vmem:[#allocation4 + $0x160] sm:$0xff]  ;;  %v253_v55 = vld [vmem:[#allocation6 + $0xb0] sm:$0xff] }
  0x46   :  { %176 = vmatprep.subr.mxu0 %v100_v18  ;;  %480 = vmatpush3.msra.mxu1 %v241_v41  ;;  %v130_v56 = vld [vmem:[#allocation4 + $0x158] sm:$0xff]  ;;  %v237_v57 = vld [vmem:[#allocation6 + $0x30] sm:$0xff]  ;;  %v252_v59 = vld [vmem:[#allocation6 + $0xa8] sm:$0xff]  ;;  %v660_v18 = vmov 0.0  }
  0x47   :  { %177 = vmatpush1.msra.mxu0 %v99_v21  ;;  %481 = vmatprep.subr.mxu1 %v256_v43  ;;  %v129_v58 = vld [vmem:[#allocation4 + $0x150] sm:$0xff]  ;;  %v128_v60 = vld [vmem:[#allocation4 + $0x148] sm:$0xff]  ;;  %v127_v62 = vld [vmem:[#allocation4 + $0x140] sm:$0xff]  ;;  %v139_v21 = vsub.s32 0, %v138_v20 }
  0x48   :  { %178 = vmatprep.subr.mxu0 %v98_v24  ;;  %482 = vmatpush3.msra.mxu1 %v240_v45  ;;  %v236_v61 = vld [vmem:[#allocation6 + $0x28] sm:$0xff]  ;;  %v251_v63 = vld [vmem:[#allocation6 + $0xa0] sm:$0xff]  ;;  %v126_v0 = vld [vmem:[#allocation4 + $0x138] sm:$0xff] }
  0x49   :  { %179 = vmatpush1.msra.mxu0 %v97_v26  ;;  %483 = vmatprep.subr.mxu1 %v255_v47  ;;  %v235_v1 = vld [vmem:[#allocation6 + $0x20] sm:$0xff]  ;;  %v125_v2 = vld [vmem:[#allocation4 + $0x130] sm:$0xff]  ;;  %v124_v3 = vld [vmem:[#allocation4 + $0x128] sm:$0xff] }
  0x4a   :  { %180 = vmatprep.subr.mxu0 %v96_v28  ;;  %484 = vmatpush3.msra.mxu1 %v239_v49  ;;  %v123_v4 = vld [vmem:[#allocation4 + $0x120] sm:$0xff]  ;;  %v122_v5 = vld [vmem:[#allocation4 + $0x118] sm:$0xff]  ;;  %v121_v6 = vld [vmem:[#allocation4 + $0x110] sm:$0xff] }
  0x4b   :  { %181 = vmatpush1.msra.mxu0 %v95_v30  ;;  %485 = vmatprep.subr.mxu1 %v254_v51  ;;  %v120_v7 = vld [vmem:[#allocation4 + $0x108] sm:$0xff]  ;;  %v119_v8 = vld [vmem:[#allocation4 + $0x100] sm:$0xff]  ;;  %v85_v9 = vld [vmem:[#allocation2] sm:$0xff] }
  0x4c   :  { %182 = vmatprep.subr.mxu0 %v94_v32  ;;  %486 = vmatpush3.msra.mxu1 %v238_v53  ;;  %v250_v10 = vld [vmem:[#allocation6 + $0x98] sm:$0xff]  ;;  %v249_v12 = vld [vmem:[#allocation6 + $0x90] sm:$0xff]  ;;  %v248_v14 = vld [vmem:[#allocation6 + $0x88] sm:$0xff] }
  0x4d   :  { %183 = vmatpush1.msra.mxu0 %v93_v34  ;;  %487 = vmatprep.subr.mxu1 %v253_v55  ;;  %v234_v11 = vld [vmem:[#allocation6 + $0x18] sm:$0xff]  ;;  %v233_v13 = vld [vmem:[#allocation6 + $0x10] sm:$0xff]  ;;  %v232_v15 = vld [vmem:[#allocation6 + $0x8] sm:$0xff] }
  0x4e   :  { %184 = vmatprep.subr.mxu0 %v92_v36  ;;  %488 = vmatpush3.msra.mxu1 %v237_v57  ;;  %v247_v16 = vld [vmem:[#allocation6 + $0x80] sm:$0xff]  ;;  %v135_v22 = vld [vmem:[%s761_s2] sm:$0x3]  ;;  %v356_v32 = vld [vmem:[#allocation7 + $0x78] sm:$0xff] }
  0x4f   :  { %185 = vmatpush1.msra.mxu0 %v91_v38  ;;  %489 = vmatprep.subr.mxu1 %v252_v59  ;;  %v231_v17 = vld [vmem:[#allocation6] sm:$0xff]  ;;  %v140_v24 = vrot.slane %v135_v22, %v139_v21  ;;  %v144_v25 = vrot.slane %v135_v22, %v143_v23  ;;  %v355_v33 = vld [vmem:[#allocation7 + $0x70] sm:$0xff]  ;;  %v354_v34 = vld [vmem:[#allocation7 + $0x68] sm:$0xff] }
  0x50   :  { %186 = vmatprep.subr.mxu0 %v90_v40  ;;  %490 = vmatpush3.msra.mxu1 %v236_v61  ;;  %v353_v35 = vld [vmem:[#allocation7 + $0x60] sm:$0xff]  ;;  %v352_v36 = vld [vmem:[#allocation7 + $0x58] sm:$0xff]  ;;  %v351_v37 = vld [vmem:[#allocation7 + $0x50] sm:$0xff] }
  0x51   :  { %187 = vmatpush1.msra.mxu0 %v89_v42  ;;  %491 = vmatprep.subr.mxu1 %v251_v63  ;;  %v350_v38 = vld [vmem:[#allocation7 + $0x48] sm:$0xff]  ;;  %v349_v39 = vld [vmem:[#allocation7 + $0x40] sm:$0xff]  ;;  %v348_v40 = vld [vmem:[#allocation7 + $0x38] sm:$0xff] }
  0x52   :  { %188 = vmatprep.subr.mxu0 %v88_v44  ;;  %492 = vmatpush3.msra.mxu1 %v235_v1  ;;  %v347_v41 = vld [vmem:[#allocation7 + $0x30] sm:$0xff]  ;;  %v346_v42 = vld [vmem:[#allocation7 + $0x28] sm:$0xff]  ;;  %v345_v43 = vld [vmem:[#allocation7 + $0x20] sm:$0xff] }
  0x53   :  { %189 = vmatpush1.msra.mxu0 %v87_v46  ;;  %493 = vmatprep.subr.mxu1 %v250_v10  ;;  %v344_v44 = vld [vmem:[#allocation7 + $0x18] sm:$0xff]  ;;  %v343_v45 = vld [vmem:[#allocation7 + $0x10] sm:$0xff]  ;;  %v342_v46 = vld [vmem:[#allocation7 + $0x8] sm:$0xff] }
  0x54   :  { %462 = vmatprep.subr.msk.mxu0 %vm151_vm1, %v134_v48  ;;  %494 = vmatpush3.msra.mxu1 %v234_v11  ;;  %v341_v47 = vld [vmem:[#allocation7] sm:$0xff]  ;;  %v465_v49 = vld [vmem:[%s763_s4] ss:$0 sm:$0xff] }
  0x55   :  { %463 = vmatpush2.msk.msra.mxu0 %vm151_vm1, %v133_v50  ;;  %495 = vmatprep.subr.mxu1 %v249_v12 }
  0x56   :  { %208 = vmatprep.subr.mxu0 %v132_v52  ;;  %496 = vmatpush3.msra.mxu1 %v233_v13 }
  0x57   :  { %209 = vmatpush2.msra.mxu0 %v131_v54  ;;  %497 = vmatprep.subr.mxu1 %v248_v14  ;;  %v466_v54 = vld [vmem:[%s765_s6] ss:$0 sm:$0xff] }
  0x58   :  { %210 = vmatprep.subr.mxu0 %v130_v56  ;;  %498 = vmatpush3.msra.mxu1 %v232_v15 }
  0x59   :  { %211 = vmatpush2.msra.mxu0 %v129_v58  ;;  %499 = vmatprep.subr.mxu1 %v247_v16  ;;  %v467_v58 = vld [vmem:[%s766_s7] ss:$0 sm:$0xff] }
  0x5a   :  { %212 = vmatprep.subr.mxu0 %v128_v60  ;;  %500 = vmatpush3.msra.mxu1 %v231_v17  ;;  %v468_v60 = vld [vmem:[%s767_s8] ss:$0 sm:$0xff] }
  0x5b   :  { %213 = vmatpush2.msra.mxu0 %v127_v62  ;;  %521 = vmatprep.subr.mxu1 %v660_v18 }
  0x5c   :  { %214 = vmatprep.subr.mxu0 %v126_v0 }
  0x5d   :  { %215 = vmatpush2.msra.mxu0 %v125_v2 }
  0x5e   :  { %216 = vmatprep.subr.mxu0 %v124_v3 }
  0x5f   :  { %217 = vmatpush2.msra.mxu0 %v123_v4 }
  0x60   :  { %218 = vmatprep.subr.mxu0 %v122_v5 }
  0x61   :  { %219 = vmatpush2.msra.mxu0 %v121_v6 }
  0x62   :  { %220 = vmatprep.subr.mxu0 %v120_v7 }
  0x63   :  { %221 = vmatpush2.msra.mxu0 %v119_v8 }
  0x64   :  { %223 = vmatmul.mubr.f32.vlgmr.msra.gmra.mxu0 %v85_v9 }
 0x124   :  { %v224_v26 = vpop.f32.mrf.mxu0 }
 0x125   :  { %v225_v27 = vadd.f32 %v224_v26, %v140_v24 }
 0x126   :  { %v226_v28 = vpop.f32.mrf.mxu0 }
 0x127   :  { %v227_v29 = vadd.f32 %v226_v28, %v144_v25  ;;  %v229_v31 = vmax.f32 %v225_v27, 0.0 }
 0x129   :  { %v230_v30 = vmax.f32 %v227_v29, 0.0 }
 0x12b   :  { %334 = vmatprep.mubr.f32.mxu1 %v230_v30 }
 0x12c   :  { %335 = vmatmul.mubr.f32.vlgmr.msra.gmra.mxu1 %v229_v31 }
 0x12d   :  { %522 = vmatpush3.msra.mxu1 %v356_v32  ;;  %553 = vmatprep.mubr.msk.f32.mxu1 %vm661_vm2, %v660_v18 }
 0x12e   :  { %523 = vmatprep.subr.mxu1 %v660_v18 }
 0x12f   :  { %524 = vmatpush3.msra.mxu1 %v355_v33 }
 0x130   :  { %525 = vmatprep.subr.mxu1 %v660_v18 }
 0x131   :  { %526 = vmatpush3.msra.mxu1 %v354_v34 }
 0x132   :  { %527 = vmatprep.subr.mxu1 %v660_v18 }
 0x133   :  { %528 = vmatpush3.msra.mxu1 %v353_v35 }
 0x134   :  { %529 = vmatprep.subr.mxu1 %v660_v18 }
 0x135   :  { %530 = vmatpush3.msra.mxu1 %v352_v36 }
 0x136   :  { %531 = vmatprep.subr.mxu1 %v660_v18 }
 0x137   :  { %532 = vmatpush3.msra.mxu1 %v351_v37 }
 0x138   :  { %533 = vmatprep.subr.mxu1 %v660_v18 }
 0x139   :  { %534 = vmatpush3.msra.mxu1 %v350_v38 }
 0x13a   :  { %535 = vmatprep.subr.mxu1 %v660_v18 }
 0x13b   :  { %536 = vmatpush3.msra.mxu1 %v349_v39 }
 0x13c   :  { %537 = vmatprep.subr.mxu1 %v660_v18 }
 0x13d   :  { %538 = vmatpush3.msra.mxu1 %v348_v40 }
 0x13e   :  { %539 = vmatprep.subr.mxu1 %v660_v18 }
 0x13f   :  { %540 = vmatpush3.msra.mxu1 %v347_v41 }
 0x140   :  { %541 = vmatprep.subr.mxu1 %v660_v18 }
 0x141   :  { %542 = vmatpush3.msra.mxu1 %v346_v42 }
 0x142   :  { %543 = vmatprep.subr.mxu1 %v660_v18 }
 0x143   :  { %544 = vmatpush3.msra.mxu1 %v345_v43 }
 0x144   :  { %545 = vmatprep.subr.mxu1 %v660_v18 }
 0x145   :  { %546 = vmatpush3.msra.mxu1 %v344_v44 }
 0x146   :  { %547 = vmatprep.subr.mxu1 %v660_v18 }
 0x147   :  { %548 = vmatpush3.msra.mxu1 %v343_v45 }
 0x148   :  { %549 = vmatprep.subr.mxu1 %v660_v18 }
 0x149   :  { %550 = vmatpush3.msra.mxu1 %v342_v46 }
 0x14a   :  { %551 = vmatprep.subr.mxu1 %v660_v18 }
 0x14b   :  { %552 = vmatpush3.msra.mxu1 %v341_v47 }
 0x1ec   :  { %v501_v48 = vpop.f32.mrf.mxu1 }
 0x1ee   :  { %v502_v50 = vpop.f32.mrf.mxu1 }
 0x1ef   :  { %v503_v51 = vadd.f32 %v502_v50, %v501_v48 }
 0x1f1   :  { %v337_v52 = vadd.f32 %v503_v51, %v465_v49 }
 0x1f3   :  { %v340_v53 = vmax.f32 %v337_v52, 0.0 }
 0x1f5   :  { %554 = vmatmul.mubr.f32.vlgmr.msra.gmra.mxu1 %v340_v53 }
 0x2b5   :  { %v430_v55 = vpop.f32.mrf.mxu1 }
 0x2b6   :  { %v431_v56 = vadd.f32 %v466_v54, %v430_v55 }
 0x2b7   :  { %v555_v57 = vpop.f32.mrf.mxu1 }
 0x2b8   :  { %v434_v59 = vmax.f32 %v431_v56, 0.0 }
 0x2ba   :  { %v442_v61 = vmul.f32 %v467_v58, %v434_v59 }
 0x2bc   :  { %v450_v62 = vadd.f32 %v468_v60, %v442_v61 }
 0x2be   :  { %451 = vadd.xlane.f32.xlu0 %v450_v62 }
 0x347   :  { %v452_v63 = vpop.xlane.xlu0 %451 }
 0x348   :  { %454 = vst.msk [vmem:[%s768_s9] sm:$0xff] %vm453_vm3, %v452_v63 }
 0x349   :  { %459 = vsyncpa [#allocation3], 1 }
 0x34a   :  { %460 = vsyncpa [#allocation5], 1 }
 0x34b   :  { %461 = vsyncpa [#allocation8], 1 }

</bundles_post_ra>
